<compile_context>
chip_gen: v5e
topology: v5e:2x2
jax: 0.10.0
libtpu: 0.0.40
codegen_flags: <defaults>
</compile_context>

<pallas_src>
from typing import NamedTuple

import jax
import jax.numpy as jnp
from jax.experimental import pallas as pl
from jax.experimental.pallas import tpu as pltpu

_ISSUE_UNROLL = 8                 # row-DMA descriptors issued per loop iter
_NUM_SPLITS = 2                   # outer "parallel" grid axis (v7x: 2 TCs)
_VMEM_BUDGET = 8 * 1024 * 1024    # gather-path VMEM budget (v7x-safe)
_FAST_PATH_TABLE_BYTES = 1 << 20  # tables up to this size use the VMEM/MXU path


def _round_up(x, m):
    return ((x + m - 1) // m) * m


def _cdiv(a, b):
    return -(-a // b)


def _sublane_multiple(dtype):
    # native packed sublane multiple: 8 for f32, 16 for bf16, 32 for int8/fp8
    return max(8, 32 // jnp.dtype(dtype).itemsize)


class PreparedAttentionWeights(NamedTuple):
    table: jax.Array   # (l_pad, hidden_pad): padded table + sentinel zero row
    labels_num: int
    hidden: int


def prepare_attention_weights(table):
    """One-time table prep (hoisted out of the per-call forward path).

    Appends a sentinel zero row at index `labels_num` (out-of-range ids are
    remapped to it, reproducing the module's untouched-zero semantics) and pads
    rows/columns to TPU tile multiples so every kernel store is lane-dense.
    """
    labels_num, hidden = table.shape
    sub = _sublane_multiple(table.dtype)
    hidden_pad = max(128, _round_up(hidden, 128))
    l_pad = _round_up(labels_num + 1, sub)
    padded = jnp.zeros((l_pad, hidden_pad), table.dtype)
    padded = padded.at[:labels_num, :hidden].set(table)
    return PreparedAttentionWeights(padded, labels_num, hidden)


# --------------------------------------------------------------------------
# Fast path (small tables): table resident in VMEM, gather == one-hot @ table.
# --------------------------------------------------------------------------
def _onehot_gather_kernel(ids_ref, tbl_ref, out_ref):
    # ids_ref : VMEM (tm, 1) int32, remapped (sentinel for OOB / padding)
    # tbl_ref : VMEM (l_pad, hidden_pad) full table
    # out_ref : VMEM (tm, hidden_pad)
    ids = ids_ref[...]
    tm, l_pad = ids.shape[0], tbl_ref.shape[0]
    iota = jax.lax.broadcasted_iota(jnp.int32, (tm, l_pad), 1)
    onehot = (iota == ids).astype(tbl_ref.dtype)       # exact 0/1 rows
    out_ref[...] = jnp.dot(
        onehot, tbl_ref[...], preferred_element_type=jnp.float32
    ).astype(out_ref.dtype)


# --------------------------------------------------------------------------
# Gather path (large tables): table stays in HBM, manual double-buffered DMAs.
# --------------------------------------------------------------------------
def _make_dma_gather_kernel(tm, steps_per_split):
    def kernel(ids_ref, tbl_hbm, out_ref, buf, sem):
        # ids_ref : SMEM (n_pad,) int32 scalar-prefetch, remapped ids
        # tbl_hbm : HBM (l_pad, hidden_pad), raw ref (memory_space=pl.ANY)
        # out_ref : VMEM (tm, hidden_pad) output block
        # buf     : VMEM (2, tm, hidden_pad) double-buffered gather scratch
        # sem     : DMA semaphores, one per slot
        c = pl.program_id(0)             # split: maps to a TensorCore on v7x
        s = pl.program_id(1)             # step within this split (sequential)
        step = c * steps_per_split + s
        slot = s % 2

        def issue(gstep, dst_slot):
            # Issue tm row-gather DMAs for global step `gstep` into `dst_slot`.
            base = gstep * tm

            @pl.loop(0, tm // _ISSUE_UNROLL)
            def _issue(g):
                j0 = g * _ISSUE_UNROLL
                for u in range(_ISSUE_UNROLL):   # unrolled descriptor pushes
                    j = j0 + u
                    row = ids_ref[base + j]
                    pltpu.make_async_copy(
                        tbl_hbm.at[pl.ds(row, 1), :],
                        buf.at[dst_slot, pl.ds(j, 1), :],
                        sem.at[dst_slot],
                    ).start()

        # Prime the pipeline: the first step of each split fills its own slot.
        @pl.when(s == 0)
        def _prime():
            issue(step, slot)

        # One-step lookahead: the next step's rows stream in while this step's
        # block is waited on and stored.
        if steps_per_split > 1:
            @pl.when(s + 1 < steps_per_split)
            def _lookahead():
                issue(step + 1, 1 - slot)

        # Single wait covering all tm row copies of this slot: DMA semaphores
        # count bytes, and tm copies of (1, hidden_pad) == one (tm, hidden_pad)
        # descriptor.  (The src of a wait-only descriptor is ignored.)
        pltpu.make_async_copy(buf.at[slot], buf.at[slot], sem.at[slot]).wait()

        # One dense, lane-aligned store of the gathered block.
        out_ref[...] = buf[slot]

    return kernel


def _pick_block_rows(n, hidden_pad, dtype, block_rows=None):
    sub = _sublane_multiple(dtype)
    if block_rows is not None:
        return max(sub, _round_up(block_rows, sub))
    itemsize = jnp.dtype(dtype).itemsize
    # ~4x (tm x hidden_pad) buffers live at once (2 gather slots + 2 pipelined
    # output buffers); stay inside a conservative budget (v7x: 64 MiB VMEM).
    cap = max(sub, (_VMEM_BUDGET // (4 * hidden_pad * itemsize)) // sub * sub)
    tm_max = min(512, cap)
    if n >= 2 * tm_max:
        return tm_max
    # Small / medium n: split into (at least) two balanced blocks so both v7x
    # TensorCores get work.
    return max(sub, _round_up(_cdiv(n, _NUM_SPLITS), sub))


def attention_weights_forward(inputs, prepared, *, use_fast_path=None,
                              block_rows=None):
    """Pallas equivalent of AttentionWeights.forward.

    inputs   : int array, arbitrary shape; ids outside [0, labels_num) produce
               zero rows (matching the module's untouched zero init).
    prepared : PreparedAttentionWeights from prepare_attention_weights().
    returns  : (*inputs.shape, hidden) array of the table's dtype.
    """
    table = prepared.table
    labels_num, hidden = prepared.labels_num, prepared.hidden
    l_pad, hidden_pad = table.shape
    dtype = table.dtype
    itemsize = jnp.dtype(dtype).itemsize

    orig_shape = inputs.shape
    flat = inputs.reshape(-1).astype(jnp.int32)
    n = int(flat.shape[0])
    if n == 0:
        return jnp.zeros((*orig_shape, hidden), dtype=dtype)

    # Remap out-of-range ids to the sentinel zero row.
    valid = (flat >= 0) & (flat < labels_num)
    ids = jnp.where(valid, flat, labels_num).astype(jnp.int32)

    tm = _pick_block_rows(n, hidden_pad, dtype, block_rows)
    n_pad = _round_up(n, _NUM_SPLITS * tm)
    steps_per_split = n_pad // (_NUM_SPLITS * tm)
    if n_pad > n:
        ids = jnp.concatenate(
            [ids, jnp.full((n_pad - n,), labels_num, dtype=jnp.int32)])

    if use_fast_path is None:
        use_fast_path = l_pad * hidden_pad * itemsize <= _FAST_PATH_TABLE_BYTES

    if use_fast_path:
        # Whole table resident in VMEM; gather == one-hot(ids) @ table on MXU.
        out_flat = pl.pallas_call(
            _onehot_gather_kernel,
            out_shape=jax.ShapeDtypeStruct((n_pad, hidden_pad), dtype),
            grid=(n_pad // tm,),
            in_specs=[
                pl.BlockSpec((tm, 1), lambda i: (i, 0)),
                pl.BlockSpec((l_pad, hidden_pad), lambda i: (0, 0)),
            ],
            out_specs=pl.BlockSpec((tm, hidden_pad), lambda i: (i, 0)),
            compiler_params=pltpu.CompilerParams(
                dimension_semantics=("parallel",)),
        )(ids.reshape(n_pad, 1), table)
    else:
        # TODO(synk): for very large id counts the scalar-prefetch ids array is
        # SMEM-resident; chunk the forward at the wrapper level if it outgrows SMEM.
        grid_spec = pltpu.PrefetchScalarGridSpec(
            num_scalar_prefetch=1,            # ids in SMEM drive the row DMAs
            grid=(_NUM_SPLITS, steps_per_split),
            in_specs=[pl.BlockSpec(memory_space=pl.ANY)],  # table stays in HBM
            out_specs=pl.BlockSpec(
                (tm, hidden_pad),
                lambda c, s, ids_ref: (c * steps_per_split + s, 0)),
            scratch_shapes=[
                pltpu.VMEM((2, tm, hidden_pad), dtype),
                pltpu.SemaphoreType.DMA((2,)),
            ],
        )
        out_flat = pl.pallas_call(
            _make_dma_gather_kernel(tm, steps_per_split),
            grid_spec=grid_spec,
            out_shape=jax.ShapeDtypeStruct((n_pad, hidden_pad), dtype),
            compiler_params=pltpu.CompilerParams(
                # Outer split axis is parallel (v7x dual TensorCore); the inner
                # axis carries the DMA lookahead so it must stay sequential.
                dimension_semantics=("parallel", "arbitrary")),
        )(ids, table)

    if n_pad != n or hidden_pad != hidden:
        out_flat = out_flat[:n, :hidden]
    return out_flat.reshape(*orig_shape, hidden)


def init_attention_weights(labels_num, hidden_size, num_shards, key):
    """Deterministic re-implementation of AttentionWeights.__init__.

    Builds the per-shard embedding tables (uniform(-std, std) with
    std = sqrt(6 / (labels_num + hidden))) and concatenates them into one
    (labels_num, hidden) table.
    """
    assert labels_num >= num_shards
    group_size, plus_num = labels_num // num_shards, labels_num % num_shards
    group = [group_size + 1] * plus_num + [group_size] * (num_shards - plus_num)
    assert sum(group) == labels_num
    std = (6.0 / (labels_num + hidden_size)) ** 0.5
    tables = []
    for i, size in enumerate(group):
        k = jax.random.fold_in(key, i)
        tables.append(jax.random.uniform(
            k, (size, hidden_size), dtype=jnp.float32, minval=-std, maxval=std))
    return jnp.concatenate(tables, axis=0)


if __name__ == "__main__":
    key = jax.random.PRNGKey(0)

    labels_num = 70   # total labels across shards (uneven groups: 24/23/23)
    hidden = 96       # hidden_size (not a multiple of 128 -> exercises padding)
    num_shards = 3    # emulates len(device_ids)
    batch, seq = 2, 8

    k_tab, k_ids, k_ids2 = jax.random.split(key, 3)
    table = init_attention_weights(labels_num, hidden, num_shards, k_tab)
    prepared = prepare_attention_weights(table)   # hoisted, one-time table prep

    def reference(ids):
        valid = (ids >= 0) & (ids < labels_num)
        safe = jnp.clip(ids, 0, labels_num - 1)
        return jnp.where(valid[..., None], jnp.take(table, safe, axis=0), 0.0)

    # Case 1: small batch, both dispatch paths, with out-of-range ids that must
    # come back as zero rows (matching the PyTorch module).
    inputs = jax.random.randint(k_ids, (batch, seq), 0, labels_num, dtype=jnp.int32)
    inputs = inputs.at[0, 0].set(labels_num + 5)
    inputs = inputs.at[1, 3].set(-2)

    out_fast = attention_weights_forward(inputs, prepared, use_fast_path=True)
    out_dma = attention_weights_forward(inputs, prepared, use_fast_path=False)
    ref1 = reference(inputs)
    jax.block_until_ready((out_fast, out_dma))

    assert out_fast.shape == (batch, seq, hidden) and out_fast.dtype == jnp.float32
    assert out_dma.shape == (batch, seq, hidden) and out_dma.dtype == jnp.float32
    assert jnp.allclose(out_fast, ref1)
    assert jnp.allclose(out_dma, ref1)
    assert bool(jnp.all(out_fast[0, 0] == 0)) and bool(jnp.all(out_dma[0, 0] == 0))
    assert bool(jnp.all(out_fast[1, 3] == 0)) and bool(jnp.all(out_dma[1, 3] == 0))

    # Case 2: exercise the multi-step DMA pipeline (prime + lookahead + slot
    # cycling): small block_rows -> grid = (2 splits, 4 steps per split).
    inputs2 = jax.random.randint(k_ids2, (4, 16), 0, labels_num, dtype=jnp.int32)
    inputs2 = inputs2.at[2, 5].set(labels_num)    # boundary id -> zero row
    out2 = attention_weights_forward(inputs2, prepared, use_fast_path=False,
                                     block_rows=8)
    out2 = jax.block_until_ready(out2)
    assert out2.shape == (4, 16, hidden)
    assert jnp.allclose(out2, reference(inputs2))
    assert bool(jnp.all(out2[2, 5] == 0))

    print("KERNEL_OK")
</pallas_src>

<mosaic_0001>
module attributes {stable_mosaic.version = 11 : i64} {
  func.func @_onehot_gather_kernel(%arg0: i32, %arg1: memref<8x1xi32, #tpu.memory_space<vmem>>, %arg2: memref<72x128xf32, #tpu.memory_space<vmem>>, %arg3: memref<8x128xf32, #tpu.memory_space<vmem>>) attributes {dimension_semantics = [#tpu.dimension_semantics<parallel>], iteration_bounds = array<i64: 2>, scalar_prefetch = 0 : i64, scratch_operands = 0 : i64, tpu.core_type = #tpu.core_type<tc>, window_params = [{transform_indices = @transform_0, window_bounds = array<i64: 8, 1>}, {pipeline_mode = #tpu.pipeline_mode<synchronous>, transform_indices = @transform_1, window_bounds = array<i64: 72, 128>}, {transform_indices = @transform_2, window_bounds = array<i64: 8, 128>}]} {
    %c0 = arith.constant 0 : index
    %c0_0 = arith.constant 0 : index
    %0 = vector.load %arg1[%c0, %c0_0] : memref<8x1xi32, #tpu.memory_space<vmem>>, vector<8x1xi32>
    %1 = tpu.iota {dimensions = array<i32: 1>} : vector<8x72xi32>
    %2 = vector.broadcast %0 : vector<8x1xi32> to vector<8x72xi32>
    %3 = arith.cmpi eq, %1, %2 : vector<8x72xi32>
    %4 = arith.extui %3 : vector<8x72xi1> to vector<8x72xi32>
    %5 = arith.sitofp %4 : vector<8x72xi32> to vector<8x72xf32>
    %c0_1 = arith.constant 0 : index
    %c0_2 = arith.constant 0 : index
    %6 = vector.load %arg2[%c0_1, %c0_2] : memref<72x128xf32, #tpu.memory_space<vmem>>, vector<72x128xf32>
    %cst = arith.constant dense<0.000000e+00> : vector<8x128xf32>
    %7 = tpu.matmul %5, %6, %cst {dimension_numbers = #tpu.dot_dimension_numbers<[1], [0], [0], [1], [0, 0, 1, 1], [], []>} : vector<8x72xf32>, vector<72x128xf32>, vector<8x128xf32> -> vector<8x128xf32>
    %c0_3 = arith.constant 0 : index
    %c0_4 = arith.constant 0 : index
    %8 = vector.load %arg3[%c0_3, %c0_4] : memref<8x128xf32, #tpu.memory_space<vmem>>, vector<8x128xf32>
    tpu.vector_store %arg3[%c0_3, %c0_4], %7 {strides = array<i32>} : memref<8x128xf32, #tpu.memory_space<vmem>>, vector<8x128xf32>,
    return
  }
  func.func @transform_0(%arg0: i32) -> (i32, i32) {
    %c0_i32 = arith.constant 0 : i32
    %c0_i32_0 = arith.constant 0 : i32
    return %arg0, %c0_i32 : i32, i32
  }
  func.func @transform_1(%arg0: i32) -> (i32, i32) {
    %c0_i32 = arith.constant 0 : i32
    %c0_i32_0 = arith.constant 0 : i32
    %c0_i32_1 = arith.constant 0 : i32
    return %c0_i32, %c0_i32_0 : i32, i32
  }
  func.func @transform_2(%arg0: i32) -> (i32, i32) {
    %c0_i32 = arith.constant 0 : i32
    %c0_i32_0 = arith.constant 0 : i32
    return %arg0, %c0_i32 : i32, i32
  }
}

</mosaic_0001>

<bundles_post_ra>
// kernel: tpu_custom_call.1
= control target key start
LH: loop header
LB: loop body
LE: loop exit
PB: predicated region body
PF: predicated region fallthrough
CT: control target
= control target key end

     0   :  { %7 = vsyncpa [#allocation3], 0  ;;  %s568_s0 = inlined_call_operand.vmem [shape: s32[16,1], index: 0, kind: input, shape index: {}]   ;;  %s569_s1 = inlined_call_operand.hbm [shape: f32[72,128], index: 1, kind: input, shape index: {}]   ;;  %s570_s2 = inlined_call_operand.hbm [shape: f32[16,128], index: 2, kind: output, shape index: {}]  }
   0x1   :  { %8 = vsyncpa [#allocation4], 0 }
   0x2   :  { %10 = vsyncpa [#allocation4 + $0x1], 0  ;;  %s473_s9 = smov 0   ;;  %s475_s10 = smov 0  }
   0x3   :  { %s477_s11 = smov 0   ;;  %s479_s12 = smov 0  }
   0x4 LB: > { %s494_s13 = sadd.s32 4294967295, %s451_s12   ;;  %s286_s14 = sadd.s32 4294967294, %s451_s12   ;;  %s451_s12 = sphi %s479_s12, %s576_s12   ;;  %s447_s11 = sphi %s477_s11, %s575_s11   ;;  %s443_s10 = sphi %s475_s10, %s574_s10   ;;  %s439_s9 = sphi %s473_s9, %s573_s9  }
   0x5   : > { %s498_s15 = sadd.s32 1, %s451_s12   ;;  %s70_s16 = sadd.s32 1, %s447_s11 }
   0x6   : > { %s67_s17 = ssub.s32 %s451_s12, %s498_s15  ;;  %p80_p0 = scmp.ne.s32.totalorder %s447_s11, %s443_s10 }
   0x7   : > { %p68_p1 = scmp.eq.s32.totalorder %s67_s17, 0  ;;  %p81_p2 = scmp.eq.s32.totalorder %s494_s13, 1 }
   0x8   : > { %p86_p3 = scmp.ne.s32.totalorder %s443_s10, %s439_s9  ;;  %p87_p4 = scmp.eq.s32.totalorder %s286_s14, 1 }
   0x9   : > { %s509_s18 = scalar_select %p68_p1, %s447_s11, %s70_s16  }
   0xa   : > { %p511_p5 = por %p81_p2, %p80_p0  ;;  %p515_p6 = por %p87_p4, %p86_p3 }
   0xb   : > { %p287_p7 = scmp.ge.s32.totalorder %s451_s12, 1  ;;  %p94_p8 = scmp.lt.s32.totalorder %s451_s12, 3 }
   0xc   : > { %p314_p9 = scmp.eq.s32.totalorder %s494_s13, 0  ;;  %s105_s23 = sshll.u32 %s569_s1, 4  ;;  %s106_s23 = int_to_ptr.hbm [resolvable:$true] %s105_s23 }
   0xd   : > { %p95_p10 = pnand %p287_p7, %p94_p8  ;;  %s453_s24 = smov [#allocation2]  }
   0xe   : > { %s107_s25 = sshll.u32 %s453_s24, 4  ;;  %s454_s26 = smov 128   ;;  %s108_s25 = int_to_ptr.vmem [resolvable:$true] %s107_s25 }
   0xf   : > { %p306_p11 = pneg %p95_p10  ;;  %s455_s27 = smov 8  }
  0x10   : > { %130 = sbr.rel (%p95_p10) target bundleno = 275 (0x113), region = 28 }
  0x11   : > { %p307_p12 = pnand %p314_p9, %p306_p11 }
  0x13   : > { %309 = dma.hbm_to_vmem [thread:$0]  (!%p307_p12), %s106_s23, 1152, %s108_s25, [#allocation3], %s454_s26, %s454_s26, %s455_s27  }
  0x15   : > { %430 = dma.done.wait (%p314_p9), [#allocation3], 1152  }
  0x16   : > { %432 = vsyncadd (%p314_p9), [#allocation3], 4294966144  ;;  %p152_p13 = scmp.lt.s32.totalorder %s494_s13, 1  ;;  %v456_v0 = vmov 0   ;;  %v173_v2 = vld [vmem:[#allocation2 + $0x40] sm:$0xff]  ;;  %v172_v3 = vld [vmem:[#allocation2 + $0x38] sm:$0xff]  ;;  %v157_v11 = vlaneseq }
  0x17   : > { %354 = vset.pattern.permute.xlu0 %v456_v0  ;;  %185 = vmatpush.msra.mxu0 %v173_v2  ;;  %v171_v4 = vld [vmem:[#allocation2 + $0x30] sm:$0xff]  ;;  %v170_v5 = vld [vmem:[#allocation2 + $0x28] sm:$0xff]  ;;  %v169_v6 = vld [vmem:[#allocation2 + $0x20] sm:$0xff]  ;;  %vm174_vm0 = vcmask 588800   ;;  %v457_v14 = vmov 0.0   ;;  %s149_s5 = sand.u32 1, %s443_s10  }
  0x18   : > { %s153_s28 = scalar_select %p152_p13, %s494_s13, 1  ;;  %v168_v7 = vld [vmem:[#allocation2 + $0x18] sm:$0xff]  ;;  %v167_v8 = vld [vmem:[#allocation2 + $0x10] sm:$0xff]  ;;  %v166_v9 = vld [vmem:[#allocation2 + $0x8] sm:$0xff]  ;;  %v158_v12 = vand.u32 127, %v157_v11 }
  0x19   : > { %186 = vmatpush.msra.mxu0 %v172_v3  ;;  %v165_v10 = vld [vmem:[#allocation2] sm:$0xff]  ;;  %s292_s6 = sshll.u32 %s149_s5, 3  ;;  %s297_s7 = sshll.u32 %s494_s13, 3 }
  0x1a   : > { %s293_s29 = sshll.u32 %s153_s28, 3  ;;  %s210_s16 = scalar_lea.hbm %s570_s2, %s297_s7 }
  0x1b   : > { %s155_s4 = scalar_lea.vmem %s568_s0, %s293_s29  ;;  %187 = vmatpush.msra.mxu0 %v171_v4  ;;  %s151_s17 = scalar_lea.vmem [#allocation5], %s292_s6 }
  0x1c   : > { %v156_v1 = vld [vmem:[%s155_s4] sm:$0xff]  ;;  %s212_s21 = sshll.u32 %s151_s17, 4  ;;  %s214_s22 = sshll.u32 %s210_s16, 4  ;;  %s213_s21 = int_to_ptr.vmem [resolvable:$true] %s212_s21  ;;  %s215_s22 = int_to_ptr.hbm [resolvable:$true] %s214_s22 }
  0x1d   : > { %160 = vperm.xlu0 %354, %v156_v1   ;;  %188 = vmatpush.msra.mxu0 %v170_v5  ;;  %s200_s23 = scalar_lea.sflag [#allocation4], %s149_s5  ;;  %s399_s24 = sshra.s32 %s215_s22, 4  ;;  %s400_s24 = int_to_ptr.hbm [resolvable:$true] %s399_s24 }
  0x1e   : > { %s401_s25 = scalar_lea.hbm %s400_s24, 8  ;;  %s405_s27 = scalar_lea.hbm %s570_s2, 16 }
  0x1f   : > { %189 = vmatpush.msra.mxu0 %v169_v6  ;;  %p402_p0 = scmp.ne.s32.totalorder %s400_s24, %s401_s25  ;;  %p406_p3 = scmp.lt.s32.totalorder %s400_s24, %s570_s2 }
  0x20   : > { %p407_p4 = scmp.lt.s32.totalorder %s405_s27, %s401_s25 }
  0x21   : > { %190 = vmatpush.msra.mxu0 %v168_v7  ;;  %p403_p1 = pnand %p402_p0, %p511_p5 }
  0x22   : > { %p408_p7 = por %p407_p4, %p406_p3 }
  0x23   : > { %191 = vmatpush.msra.mxu0 %v167_v8  ;;  %p404_p2 = pneg %p403_p1 }
  0x25   : > { %192 = vmatpush.msra.mxu0 %v166_v9  ;;  %p409_p8 = pnand %p408_p7, %p404_p2 }
  0x27   : > { %193 = vmatpush.msra.mxu0 %v165_v10 }
  0x8f   : > { %v161_v13 = vpop.permute.xlu0 %160 }
  0x90   : > { %vm162_vm1 = vcmp.eq.s32.totalorder %v158_v12, %v161_v13 }
  0x91   : > { %v294_v15 = vsel %vm162_vm1, 1.0, %v457_v14 }
  0x92   : > { %295 = vmatmul.msk.f32.vlgmr.msra.gmra.mxu0 %vm174_vm0, %v294_v15 }
 0x10f   : > { %v195_v16 = vpop.f32.mrf.mxu0 }
 0x110   : > { %198 = vst [vmem:[%s151_s17] sm:$0xff] %v195_v16 }
 0x111   : > { %412 = shalt.err (!%p409_p8)
}
 0x112   : > { %304 = dma.vmem_to_hbm [thread:$0]  (%p511_p5), %s213_s21, 128, %s215_s22, %s200_s23  }
 0x113 PF: > { %p316_p9 = scmp.ge.s32.totalorder %s451_s12, 2  ;;  %s226_s30 = sand.u32 1, %s439_s9  }
 0x114   : > { %s227_s3 = scalar_lea.sflag [#allocation4], %s226_s30 }
 0x115   : > { %p311_p10 = pnand %p316_p9, %p515_p6 }
 0x117   : > { %p312_p11 = pneg %p311_p10 }
 0x119   : > { %434 = dma.done.wait (%p312_p11), %s227_s3, 128  }
 0x11a   : > { %436 = vsyncadd (%p312_p11), %s227_s3, 4294967168  ;;  %p13_p12 = scmp.ge.s32.totalorder %s498_s15, 4   ;;  %s573_s9 = smov %s443_s10 }
 0x11b   : > { %s574_s10 = smov %s447_s11  ;;  %s575_s11 = smov %s509_s18 }
 0x11c   : > { %s576_s12 = smov %s498_s15  ;;  %15 = sbr.rel (!%p13_p12) target bundleno = 4 (0x4), region = 68 }
 0x121   :  { %233 = vsyncpa [#allocation3], 1 }
 0x122   :  { %235 = vsyncpa [#allocation3 + $0x1], 1 }
 0x123   :  { %236 = vsyncpa [#allocation4], 1 }
 0x124   :  { %238 = vsyncpa [#allocation4 + $0x1], 1 }

</bundles_post_ra>
